<compile_context>
chip_gen: v7x
topology: tpu7x:2x2x1
jax: 0.10.0
libtpu: 0.0.40
codegen_flags: <defaults>
</compile_context>

<pallas_src>
import jax
import jax.numpy as jnp
from jax.experimental import pallas as pl
from jax.experimental.pallas import tpu as pltpu


def _round_up(v, m):
    return -(-v // m) * m


# Total in-kernel VMEM footprint target (double-buffered x + hidden temp +
# double-buffered output + resident weights).  12 MiB fits v5e's 16 MiB scoped
# default and leaves ample headroom on v7x (64 MiB physical).
_VMEM_SOFT_BUDGET = 12 * 1024 * 1024
# Explicit scoped-VMEM limit: >= v5e's 16 MiB default, == v6e/v7x defaults,
# well under every generation's physical VMEM.
_VMEM_LIMIT_BYTES = 32 * 1024 * 1024


def _mlp_kernel(x_ref, w1_ref, b1_ref, w2_ref, b2_ref, o_ref):
    # Layer 1 on the MXU (f32 accumulation); bias + ReLU on the VPU.
    h = jnp.dot(x_ref[...], w1_ref[...], preferred_element_type=jnp.float32)
    h = jnp.maximum(h + b1_ref[...], 0.0)                    # (TB, Hf) + (1, Hf)
    # Layer 2 (folded: N = fold outputs per folded row) on the MXU.
    out = jnp.dot(h, w2_ref[...], preferred_element_type=jnp.float32)
    o_ref[...] = (out + b2_ref[0, 0]).astype(o_ref.dtype)    # scalar bias from SMEM


def _choose_fold(batch, input_dim, hidden_dim, itemsize):
    """Largest batch-fold factor F (rows folded into the contraction axis).

    F=16 gives K = F*Din = 256 for the default Din=16 (one MXU pass on
    v6e/v7x, two on v5e).  Only used when Din is small, F divides the batch,
    and the F^2 blow-up of the block-diagonal weights stays negligible.
    """
    if input_dim >= 128:
        return 1
    for f in (16, 8, 4, 2):
        if batch % f:
            continue
        if f * input_dim > 512:
            continue
        if f * f * input_dim * hidden_dim * itemsize > (4 << 20):
            continue
        return f
    return 1


def _choose_batch_tile(bf, kf, hf, nf, itemsize):
    """Byte-sized batch tile using lane-padded VMEM accounting."""
    if bf <= 8:
        return bf                          # one block == the full (tiny) batch
    kp = _round_up(kf, 128)                # lane-padded row bytes, NOT kf
    hp = _round_up(hf, 128)
    npad = _round_up(nf, 128)
    fixed = itemsize * (2 * _round_up(kf, 8) * hp      # W1 (count x2, conservative)
                        + 2 * 8 * hp                   # b1
                        + 2 * _round_up(hf, 8) * npad)  # W2
    per_row = itemsize * (2 * kp       # x tile, double-buffered
                          + hp         # hidden-activation temporary
                          + 2 * npad)  # output tile, double-buffered
    tile = max(8, ((_VMEM_SOFT_BUDGET - fixed) // per_row) // 8 * 8)
    tile = min(tile, (bf // 8) * 8)    # never exceed the batch
    # Guarantee >= 2 grid steps so the "parallel" axis can split across v7x's
    # two TensorCores and the pipeline has something to overlap.
    if pl.cdiv(bf, tile) < 2:
        tile = max(8, _round_up(pl.cdiv(bf, 2), 8))
    return tile


def amortized_mean_forward(x, w1, b1, w2, b2, *, fold=None, batch_tile=None):
    """Forward pass of AmortizedMean:  relu(x @ W1 + b1) @ W2 + b2.

    x : (B, input_dim) float32
    w1: (input_dim, hidden_dim), b1: (1, hidden_dim)
    w2: (hidden_dim, 1),         b2: (1, 1)
    returns (B, 1) float32
    """
    B, din = x.shape
    H = w1.shape[1]
    assert w1.shape == (din, H)
    assert b1.shape == (1, H)
    assert w2.shape == (H, 1)
    assert b2.shape == (1, 1)

    itemsize = jnp.dtype(x.dtype).itemsize
    F = fold if fold is not None else _choose_fold(B, din, H, itemsize)
    if F < 1 or B % F != 0:
        F = 1

    if F > 1:
        # Fold F rows into the feature axis; reshapes are row-major bitcasts.
        eye = jnp.eye(F, dtype=w1.dtype)
        w1_f = jnp.kron(eye, w1)            # (F*Din, F*H), diagonal blocks = w1
        w2_f = jnp.kron(eye, w2)            # (F*H, F),     diagonal blocks = w2
        b1_f = jnp.tile(b1, (1, F))         # (1, F*H)
        x_f = x.reshape(B // F, F * din)
    else:
        w1_f, w2_f, b1_f, x_f = w1, w2, b1, x

    bf, kf = x_f.shape
    hf = w1_f.shape[1]
    nf = w2_f.shape[1]

    if batch_tile is None:
        tb = _choose_batch_tile(bf, kf, hf, nf, itemsize)
    else:
        tb = bf if bf <= 8 else min(max(8, (batch_tile // 8) * 8),
                                    max(8, (bf // 8) * 8))

    num_tiles = pl.cdiv(bf, tb)             # ragged tail handled by Pallas masking

    out = pl.pallas_call(
        _mlp_kernel,
        out_shape=jax.ShapeDtypeStruct((bf, nf), jnp.float32),
        grid_spec=pltpu.PrefetchScalarGridSpec(
            num_scalar_prefetch=0,
            grid=(num_tiles,),
            in_specs=[
                pl.BlockSpec((tb, kf), lambda i: (i, 0)),    # x tile (pipelined)
                pl.BlockSpec((kf, hf), lambda i: (0, 0)),    # W1 (resident)
                pl.BlockSpec((1, hf), lambda i: (0, 0)),     # b1 (resident)
                pl.BlockSpec((hf, nf), lambda i: (0, 0)),    # W2 (resident)
                pl.BlockSpec(memory_space=pltpu.MemorySpace.SMEM),  # b2 scalar
            ],
            out_specs=pl.BlockSpec((tb, nf), lambda i: (i, 0)),
        ),
        compiler_params=pltpu.CompilerParams(
            dimension_semantics=("parallel",),
            vmem_limit_bytes=_VMEM_LIMIT_BYTES),
    )(x_f, w1_f, b1_f, w2_f, b2)

    return out.reshape(B, 1)


def _init_params(key, input_dim, hidden_dim):
    """Deterministic param init mimicking nn.Linear (uniform +/- 1/sqrt(fan_in))."""
    k1, k2, k3, k4 = jax.random.split(key, 4)
    lim1 = 1.0 / jnp.sqrt(jnp.float32(input_dim))
    lim2 = 1.0 / jnp.sqrt(jnp.float32(hidden_dim))
    w1 = jax.random.uniform(k1, (input_dim, hidden_dim), jnp.float32, -lim1, lim1)
    b1 = jax.random.uniform(k2, (1, hidden_dim), jnp.float32, -lim1, lim1)
    w2 = jax.random.uniform(k3, (hidden_dim, 1), jnp.float32, -lim2, lim2)
    b2 = jax.random.uniform(k4, (1, 1), jnp.float32, -lim2, lim2)
    return w1, b1, w2, b2


if __name__ == "__main__":
    input_dim = 16
    hidden_dim = 32
    # depth is irrelevant: create_layers() returns an empty list in the module.

    key = jax.random.PRNGKey(0)
    kx1, kx2, kx3, kp = jax.random.split(key, 4)
    w1, b1, w2, b2 = _init_params(kp, input_dim, hidden_dim)

    def ref_fwd(x):
        return jnp.maximum(x @ w1 + b1, 0.0) @ w2 + b2

    # Case 1: batch divisible by 16 -> folded path (F=16, K=256), single step.
    x1 = jax.random.normal(kx1, (64, input_dim), jnp.float32)
    o1 = jax.block_until_ready(amortized_mean_forward(x1, w1, b1, w2, b2))
    assert o1.shape == (64, 1)
    assert jnp.allclose(o1, ref_fwd(x1), atol=1e-4, rtol=1e-4)

    # Case 2: B=300 -> F=4 fold (Bf=75), 2-step "parallel" grid with a ragged
    # last tile (exercises Pallas boundary masking; no jnp.pad anywhere).
    x2 = jax.random.normal(kx2, (300, input_dim), jnp.float32)
    o2 = jax.block_until_ready(amortized_mean_forward(x2, w1, b1, w2, b2))
    assert o2.shape == (300, 1)
    assert jnp.allclose(o2, ref_fwd(x2), atol=1e-4, rtol=1e-4)

    # Case 3: odd tiny batch -> unfolded fallback (F=1), single full-array block.
    x3 = jax.random.normal(kx3, (7, input_dim), jnp.float32)
    o3 = jax.block_until_ready(amortized_mean_forward(x3, w1, b1, w2, b2))
    assert o3.shape == (7, 1)
    assert jnp.allclose(o3, ref_fwd(x3), atol=1e-4, rtol=1e-4)

    print("KERNEL_OK")
</pallas_src>

<mosaic_0001>
module attributes {stable_mosaic.version = 11 : i64} {
  func.func @_mlp_kernel(%arg0: i32, %arg1: memref<4x256xf32, #tpu.memory_space<vmem>>, %arg2: memref<256x512xf32, #tpu.memory_space<vmem>>, %arg3: memref<1x512xf32, #tpu.memory_space<vmem>>, %arg4: memref<512x16xf32, #tpu.memory_space<vmem>>, %arg5: memref<1x1xf32, #tpu.memory_space<smem>>, %arg6: memref<4x16xf32, #tpu.memory_space<vmem>>) attributes {dimension_semantics = [#tpu.dimension_semantics<parallel>], iteration_bounds = array<i64: 1>, scalar_prefetch = 0 : i64, scratch_operands = 0 : i64, tpu.core_type = #tpu.core_type<tc>, window_params = [{transform_indices = @transform_0, window_bounds = array<i64: 4, 256>}, {pipeline_mode = #tpu.pipeline_mode<synchronous>, transform_indices = @transform_1, window_bounds = array<i64: 256, 512>}, {pipeline_mode = #tpu.pipeline_mode<synchronous>, transform_indices = @transform_2, window_bounds = array<i64: 1, 512>}, {pipeline_mode = #tpu.pipeline_mode<synchronous>, transform_indices = @transform_3, window_bounds = array<i64: 512, 16>}, {transform_indices = @transform_4, window_bounds = array<i64: 1, 1>}, {transform_indices = @transform_5, window_bounds = array<i64: 4, 16>}]} {
    %c0 = arith.constant 0 : index
    %c0_0 = arith.constant 0 : index
    %0 = vector.load %arg1[%c0, %c0_0] : memref<4x256xf32, #tpu.memory_space<vmem>>, vector<4x256xf32>
    %c0_1 = arith.constant 0 : index
    %c0_2 = arith.constant 0 : index
    %1 = vector.load %arg2[%c0_1, %c0_2] : memref<256x512xf32, #tpu.memory_space<vmem>>, vector<256x512xf32>
    %cst = arith.constant dense<0.000000e+00> : vector<4x512xf32>
    %2 = tpu.matmul %0, %1, %cst {dimension_numbers = #tpu.dot_dimension_numbers<[1], [0], [0], [1], [0, 0, 1, 1], [], []>} : vector<4x256xf32>, vector<256x512xf32>, vector<4x512xf32> -> vector<4x512xf32>
    %c0_3 = arith.constant 0 : index
    %c0_4 = arith.constant 0 : index
    %3 = vector.load %arg3[%c0_3, %c0_4] : memref<1x512xf32, #tpu.memory_space<vmem>>, vector<1x512xf32>
    %4 = vector.broadcast %3 : vector<1x512xf32> to vector<4x512xf32>
    %5 = arith.addf %2, %4 : vector<4x512xf32>
    %cst_5 = arith.constant 0.000000e+00 : f32
    %6 = vector.broadcast %cst_5 : f32 to vector<4x512xf32>
    %7 = arith.maximumf %5, %6 : vector<4x512xf32>
    %c0_6 = arith.constant 0 : index
    %c0_7 = arith.constant 0 : index
    %8 = vector.load %arg4[%c0_6, %c0_7] : memref<512x16xf32, #tpu.memory_space<vmem>>, vector<512x16xf32>
    %cst_8 = arith.constant dense<0.000000e+00> : vector<4x16xf32>
    %9 = tpu.matmul %7, %8, %cst_8 {dimension_numbers = #tpu.dot_dimension_numbers<[1], [0], [0], [1], [0, 0, 1, 1], [], []>} : vector<4x512xf32>, vector<512x16xf32>, vector<4x16xf32> -> vector<4x16xf32>
    %c0_9 = arith.constant 0 : index
    %c0_10 = arith.constant 0 : index
    %10 = memref.load %arg5[%c0_9, %c0_10] : memref<1x1xf32, #tpu.memory_space<smem>>
    %11 = vector.broadcast %10 : f32 to vector<4x16xf32>
    %12 = arith.addf %9, %11 : vector<4x16xf32>
    %c0_11 = arith.constant 0 : index
    %c0_12 = arith.constant 0 : index
    %13 = vector.load %arg6[%c0_11, %c0_12] : memref<4x16xf32, #tpu.memory_space<vmem>>, vector<4x16xf32>
    tpu.vector_store %arg6[%c0_11, %c0_12], %12 {strides = array<i32>} : memref<4x16xf32, #tpu.memory_space<vmem>>, vector<4x16xf32>,
    return
  }
  func.func @transform_0(%arg0: i32) -> (i32, i32) {
    %c0_i32 = arith.constant 0 : i32
    %c0_i32_0 = arith.constant 0 : i32
    return %arg0, %c0_i32 : i32, i32
  }
  func.func @transform_1(%arg0: i32) -> (i32, i32) {
    %c0_i32 = arith.constant 0 : i32
    %c0_i32_0 = arith.constant 0 : i32
    %c0_i32_1 = arith.constant 0 : i32
    return %c0_i32, %c0_i32_0 : i32, i32
  }
  func.func @transform_2(%arg0: i32) -> (i32, i32) {
    %c0_i32 = arith.constant 0 : i32
    %c0_i32_0 = arith.constant 0 : i32
    %c0_i32_1 = arith.constant 0 : i32
    return %c0_i32, %c0_i32_0 : i32, i32
  }
  func.func @transform_3(%arg0: i32) -> (i32, i32) {
    %c0_i32 = arith.constant 0 : i32
    %c0_i32_0 = arith.constant 0 : i32
    %c0_i32_1 = arith.constant 0 : i32
    return %c0_i32, %c0_i32_0 : i32, i32
  }
  func.func @transform_4(%arg0: i32) -> (i32, i32) {
    %c0_i32 = arith.constant 0 : i32
    %c0_i32_0 = arith.constant 0 : i32
    %c0_i32_1 = arith.constant 0 : i32
    return %c0_i32, %c0_i32_0 : i32, i32
  }
  func.func @transform_5(%arg0: i32) -> (i32, i32) {
    %c0_i32 = arith.constant 0 : i32
    %c0_i32_0 = arith.constant 0 : i32
    return %arg0, %c0_i32 : i32, i32
  }
}

</mosaic_0001>

<bundles_post_ra>
// kernel: tpu_custom_call.1
= control target key start
LH: loop header
LB: loop body
LE: loop exit
PB: predicated region body
PF: predicated region fallthrough
CT: control target
= control target key end

     0   :  { %11 = vsyncpa [#allocation4], 0  ;;  %s1139_s0 = inlined_call_operand.vmem [shape: f32[4,256], index: 0, kind: input, shape index: {}]   ;;  %s1140_s1 = inlined_call_operand.hbm [shape: f32[256,512], index: 1, kind: input, shape index: {}]   ;;  %s1141_s2 = inlined_call_operand.vmem [shape: f32[1,512], index: 2, kind: input, shape index: {}]   ;;  %s1142_s3 = inlined_call_operand.vmem [shape: f32[512,16], index: 3, kind: input, shape index: {}]   ;;  %s1143_s4 = inlined_call_operand.<no memory space> [shape: f32[1,1], index: 4, kind: input, shape index: {}]   ;;  %s1144_s5 = inlined_call_operand.hbm [shape: f32[4,16], index: 5, kind: output, shape index: {}]  }
   0x1   :  { %12 = vsyncpa [#allocation5], 0  ;;  %s874_s18 = smov [#allocation3]   ;;  %s826_s22 = scalar_lea.hbm %s1140_s1, 16384 }
   0x2   :  { %s20_s19 = sshll.u32 %s874_s18, 4  ;;  %p827_p0 = scmp.ne.s32.totalorder %s1140_s1, %s826_s22  ;;  %s21_s19 = int_to_ptr.vmem [resolvable:$true] %s20_s19 }
   0x3   :  { %p830_p1 = scmp.lt.u32.totalorder %s826_s22, %s1140_s1 }
   0x5   :  { %p832_p2 = pnand %p830_p1, %p827_p0 }
   0x7   :  { %835 = shalt.err (!%p832_p2)
}
   0x8   :  { %s836_s27 = scalar_lea.vmem %s21_s19, 16384  ;;  %p841_p4 = scmp.lt.s32.totalorder %s21_s19, %s21_s19 }
   0x9   :  { %p837_p3 = scmp.ne.s32.totalorder %s21_s19, %s836_s27  ;;  %p842_p5 = scmp.lt.s32.totalorder %s836_s27, %s836_s27 }
   0xb   :  { %p843_p6 = por %p842_p5, %p841_p4 }
   0xd   :  { %p844_p7 = pnand %p843_p6, %p837_p3 }
   0xf   :  { %847 = shalt.err (!%p844_p7)
}
  0x10   :  { %s875_s28 = smov 512   ;;  %s876_s29 = smov 32  }
  0x11   :  { %26 = dma.hbm_to_vmem [thread:$0]  %s1140_s1, 16384, %s21_s19, [#allocation4], %s875_s28, %s875_s28, %s876_s29  }
  0x12   :  { %870 = dma.done.wait [#allocation4], 16384  }
  0x13   :  { %871 = vsyncadd [#allocation4], 4294950912  ;;  %v38_v0 = vld [vmem:[#allocation3 + $0x8] sm:$0xff]  ;;  %v40_v2 = vld [vmem:[#allocation3 + $0x18] sm:$0xff]  ;;  %s877_s29 = smov [#allocation6]   ;;  %vm542_vm0 = vcmask 125952  }
  0x14   :  { %v42_v1 = vld [vmem:[#allocation3 + $0x28] sm:$0xff]  ;;  %v44_v4 = vld [vmem:[#allocation3 + $0x38] sm:$0xff]  ;;  %v37_v5 = vld [vmem:[#allocation3] sm:$0xff]  ;;  %s550_s30 = sshll.u32 %s877_s29, 4  ;;  %s551_s30 = int_to_ptr.vmem [resolvable:$true] %s550_s30 }
  0x15   :  { %v629_v3 = vpack.c.bf16 %v42_v1, %v38_v0  ;;  %v41_v6 = vld [vmem:[#allocation3 + $0x20] sm:$0xff]  ;;  %v693_v7 = vpack.c.bf16 %v44_v4, %v40_v2  ;;  %v39_v9 = vld [vmem:[#allocation3 + $0x10] sm:$0xff]  ;;  %v46_v11 = vld [vmem:[#allocation3 + $0x48] sm:$0xff]  ;;  %s848_s6 = scalar_lea.vmem %s551_s30, 64  ;;  %p853_p9 = scmp.lt.s32.totalorder %s551_s30, %s551_s30 }
  0x16   :  { %v631_v8 = vpack.c.bf16 %v41_v6, %v37_v5  ;;  %v43_v10 = vld [vmem:[#allocation3 + $0x30] sm:$0xff]  ;;  %v50_v13 = vld [vmem:[#allocation3 + $0x68] sm:$0xff]  ;;  %v48_v14 = vld [vmem:[#allocation3 + $0x58] sm:$0xff]  ;;  %p849_p8 = scmp.ne.s32.totalorder %s551_s30, %s848_s6  ;;  %p854_p10 = scmp.lt.s32.totalorder %s848_s6, %s848_s6 }
  0x17   :  { %630 = vmatprep.subr.bf16.mxu0 %v629_v3  ;;  %v695_v12 = vpack.c.bf16 %v43_v10, %v39_v9  ;;  %v52_v15 = vld [vmem:[#allocation3 + $0x78] sm:$0xff]  ;;  %694 = vmatprep.subr.bf16.mxu1 %v693_v7  ;;  %v633_v16 = vpack.c.bf16 %v50_v13, %v46_v11  ;;  %v45_v18 = vld [vmem:[#allocation3 + $0x40] sm:$0xff]  ;;  %v47_v20 = vld [vmem:[#allocation3 + $0x50] sm:$0xff] }
  0x18   :  { %632 = vmatpush1.bf16.msra.mxu0 %v631_v8  ;;  %v697_v17 = vpack.c.bf16 %v52_v15, %v48_v14  ;;  %v49_v19 = vld [vmem:[#allocation3 + $0x60] sm:$0xff]  ;;  %v51_v22 = vld [vmem:[#allocation3 + $0x70] sm:$0xff]  ;;  %v54_v23 = vld [vmem:[#allocation3 + $0x88] sm:$0xff]  ;;  %p855_p11 = por %p854_p10, %p853_p9 }
  0x19   :  { %696 = vmatpush1.bf16.msra.mxu1 %v695_v12  ;;  %v635_v21 = vpack.c.bf16 %v49_v19, %v45_v18  ;;  %v58_v24 = vld [vmem:[#allocation3 + $0xa8] sm:$0xff]  ;;  %634 = vmatprep.subr.bf16.mxu0 %v633_v16  ;;  %v699_v25 = vpack.c.bf16 %v51_v22, %v47_v20  ;;  %v56_v27 = vld [vmem:[#allocation3 + $0x98] sm:$0xff]  ;;  %v53_v29 = vld [vmem:[#allocation3 + $0x80] sm:$0xff] }
  0x1a   :  { %698 = vmatprep.subr.bf16.mxu1 %v697_v17  ;;  %v637_v26 = vpack.c.bf16 %v58_v24, %v54_v23  ;;  %v60_v28 = vld [vmem:[#allocation3 + $0xb8] sm:$0xff]  ;;  %v57_v31 = vld [vmem:[#allocation3 + $0xa0] sm:$0xff]  ;;  %v55_v32 = vld [vmem:[#allocation3 + $0x90] sm:$0xff]  ;;  %p856_p12 = pnand %p855_p11, %p849_p8 }
  0x1b   :  { %v701_v30 = vpack.c.bf16 %v60_v28, %v56_v27  ;;  %v59_v33 = vld [vmem:[#allocation3 + $0xb0] sm:$0xff]  ;;  %v639_v34 = vpack.c.bf16 %v57_v31, %v53_v29  ;;  %v62_v35 = vld [vmem:[#allocation3 + $0xc8] sm:$0xff]  ;;  %v64_v37 = vld [vmem:[#allocation3 + $0xd8] sm:$0xff] }
  0x1c   :  { %636 = vmatpush1.bf16.msra.mxu0 %v635_v21  ;;  %v66_v36 = vld [vmem:[#allocation3 + $0xe8] sm:$0xff]  ;;  %v703_v38 = vpack.c.bf16 %v59_v33, %v55_v32  ;;  %v68_v40 = vld [vmem:[#allocation3 + $0xf8] sm:$0xff]  ;;  %v61_v41 = vld [vmem:[#allocation3 + $0xc0] sm:$0xff] }
  0x1d   :  { %700 = vmatpush1.bf16.msra.mxu1 %v699_v25  ;;  %638 = vmatprep.subr.bf16.mxu0 %v637_v26  ;;  %v641_v39 = vpack.c.bf16 %v66_v36, %v62_v35  ;;  %v65_v42 = vld [vmem:[#allocation3 + $0xe0] sm:$0xff]  ;;  %v705_v43 = vpack.c.bf16 %v68_v40, %v64_v37  ;;  %v63_v44 = vld [vmem:[#allocation3 + $0xd0] sm:$0xff]  ;;  %v70_v46 = vld [vmem:[#allocation3 + $0x108] sm:$0xff] }
  0x1e   :  { %702 = vmatprep.subr.bf16.mxu1 %v701_v30  ;;  %v67_v45 = vld [vmem:[#allocation3 + $0xf0] sm:$0xff]  ;;  %v74_v47 = vld [vmem:[#allocation3 + $0x128] sm:$0xff]  ;;  %v72_v48 = vld [vmem:[#allocation3 + $0x118] sm:$0xff]  ;;  %v643_v50 = vpack.c.bf16 %v65_v42, %v61_v41 }
  0x1f   :  { %v76_v49 = vld [vmem:[#allocation3 + $0x138] sm:$0xff]  ;;  %v707_v51 = vpack.c.bf16 %v67_v45, %v63_v44  ;;  %v645_v52 = vpack.c.bf16 %v74_v47, %v70_v46  ;;  %v69_v53 = vld [vmem:[#allocation3 + $0x100] sm:$0xff]  ;;  %v71_v55 = vld [vmem:[#allocation3 + $0x110] sm:$0xff] }
  0x20   :  { %640 = vmatpush1.bf16.msra.mxu0 %v639_v34  ;;  %v73_v54 = vld [vmem:[#allocation3 + $0x120] sm:$0xff]  ;;  %v709_v56 = vpack.c.bf16 %v76_v49, %v72_v48  ;;  %v75_v57 = vld [vmem:[#allocation3 + $0x130] sm:$0xff]  ;;  %v78_v58 = vld [vmem:[#allocation3 + $0x148] sm:$0xff] }
  0x21   :  { %704 = vmatpush1.bf16.msra.mxu1 %v703_v38  ;;  %642 = vmatprep.subr.bf16.mxu0 %v641_v39  ;;  %v82_v59 = vld [vmem:[#allocation3 + $0x168] sm:$0xff]  ;;  %v80_v60 = vld [vmem:[#allocation3 + $0x158] sm:$0xff]  ;;  %v647_v62 = vpack.c.bf16 %v73_v54, %v69_v53  ;;  %v711_v63 = vpack.c.bf16 %v75_v57, %v71_v55  ;;  %v77_v1 = vld [vmem:[#allocation3 + $0x140] sm:$0xff] }
  0x22   :  { %706 = vmatprep.subr.bf16.mxu1 %v705_v43  ;;  %v84_v61 = vld [vmem:[#allocation3 + $0x178] sm:$0xff]  ;;  %v649_v0 = vpack.c.bf16 %v82_v59, %v78_v58  ;;  %v81_v2 = vld [vmem:[#allocation3 + $0x160] sm:$0xff]  ;;  %v79_v3 = vld [vmem:[#allocation3 + $0x150] sm:$0xff] }
  0x23   :  { %v713_v4 = vpack.c.bf16 %v84_v61, %v80_v60  ;;  %v83_v5 = vld [vmem:[#allocation3 + $0x170] sm:$0xff]  ;;  %v86_v6 = vld [vmem:[#allocation3 + $0x188] sm:$0xff]  ;;  %v88_v8 = vld [vmem:[#allocation3 + $0x198] sm:$0xff]  ;;  %v651_v10 = vpack.c.bf16 %v81_v2, %v77_v1 }
  0x24   :  { %644 = vmatpush1.bf16.msra.mxu0 %v643_v50  ;;  %v90_v7 = vld [vmem:[#allocation3 + $0x1a8] sm:$0xff]  ;;  %v92_v9 = vld [vmem:[#allocation3 + $0x1b8] sm:$0xff]  ;;  %v715_v11 = vpack.c.bf16 %v83_v5, %v79_v3  ;;  %v85_v13 = vld [vmem:[#allocation3 + $0x180] sm:$0xff] }
  0x25   :  { %708 = vmatpush1.bf16.msra.mxu1 %v707_v51  ;;  %646 = vmatprep.subr.bf16.mxu0 %v645_v52  ;;  %v653_v12 = vpack.c.bf16 %v90_v7, %v86_v6  ;;  %v89_v14 = vld [vmem:[#allocation3 + $0x1a0] sm:$0xff]  ;;  %v87_v15 = vld [vmem:[#allocation3 + $0x190] sm:$0xff]  ;;  %v717_v16 = vpack.c.bf16 %v92_v9, %v88_v8  ;;  %v94_v18 = vld [vmem:[#allocation3 + $0x1c8] sm:$0xff] }
  0x26   :  { %710 = vmatprep.subr.bf16.mxu1 %v709_v56  ;;  %v91_v17 = vld [vmem:[#allocation3 + $0x1b0] sm:$0xff]  ;;  %v98_v19 = vld [vmem:[#allocation3 + $0x1e8] sm:$0xff]  ;;  %v96_v20 = vld [vmem:[#allocation3 + $0x1d8] sm:$0xff]  ;;  %v655_v22 = vpack.c.bf16 %v89_v14, %v85_v13 }
  0x27   :  { %v100_v21 = vld [vmem:[#allocation3 + $0x1f8] sm:$0xff]  ;;  %v719_v23 = vpack.c.bf16 %v91_v17, %v87_v15  ;;  %v657_v24 = vpack.c.bf16 %v98_v19, %v94_v18  ;;  %v93_v25 = vld [vmem:[#allocation3 + $0x1c0] sm:$0xff]  ;;  %v95_v27 = vld [vmem:[#allocation3 + $0x1d0] sm:$0xff] }
  0x28   :  { %648 = vmatpush1.bf16.msra.mxu0 %v647_v62  ;;  %v97_v26 = vld [vmem:[#allocation3 + $0x1e0] sm:$0xff]  ;;  %v721_v28 = vpack.c.bf16 %v100_v21, %v96_v20  ;;  %v99_v29 = vld [vmem:[#allocation3 + $0x1f0] sm:$0xff]  ;;  %v102_v30 = vld [vmem:[#allocation3 + $0x208] sm:$0xff] }
  0x29   :  { %712 = vmatpush1.bf16.msra.mxu1 %v711_v63  ;;  %650 = vmatprep.subr.bf16.mxu0 %v649_v0  ;;  %v106_v31 = vld [vmem:[#allocation3 + $0x228] sm:$0xff]  ;;  %v104_v32 = vld [vmem:[#allocation3 + $0x218] sm:$0xff]  ;;  %v659_v34 = vpack.c.bf16 %v97_v26, %v93_v25  ;;  %v723_v35 = vpack.c.bf16 %v99_v29, %v95_v27  ;;  %v101_v37 = vld [vmem:[#allocation3 + $0x200] sm:$0xff] }
  0x2a   :  { %714 = vmatprep.subr.bf16.mxu1 %v713_v4  ;;  %v108_v33 = vld [vmem:[#allocation3 + $0x238] sm:$0xff]  ;;  %v661_v36 = vpack.c.bf16 %v106_v31, %v102_v30  ;;  %v105_v38 = vld [vmem:[#allocation3 + $0x220] sm:$0xff]  ;;  %v103_v39 = vld [vmem:[#allocation3 + $0x210] sm:$0xff] }
  0x2b   :  { %v725_v40 = vpack.c.bf16 %v108_v33, %v104_v32  ;;  %v107_v41 = vld [vmem:[#allocation3 + $0x230] sm:$0xff]  ;;  %v110_v42 = vld [vmem:[#allocation3 + $0x248] sm:$0xff]  ;;  %v112_v44 = vld [vmem:[#allocation3 + $0x258] sm:$0xff]  ;;  %v663_v46 = vpack.c.bf16 %v105_v38, %v101_v37 }
  0x2c   :  { %652 = vmatpush1.bf16.msra.mxu0 %v651_v10  ;;  %v114_v43 = vld [vmem:[#allocation3 + $0x268] sm:$0xff]  ;;  %v116_v45 = vld [vmem:[#allocation3 + $0x278] sm:$0xff]  ;;  %v727_v47 = vpack.c.bf16 %v107_v41, %v103_v39  ;;  %v109_v49 = vld [vmem:[#allocation3 + $0x240] sm:$0xff] }
  0x2d   :  { %716 = vmatpush1.bf16.msra.mxu1 %v715_v11  ;;  %654 = vmatprep.subr.bf16.mxu0 %v653_v12  ;;  %v665_v48 = vpack.c.bf16 %v114_v43, %v110_v42  ;;  %v113_v50 = vld [vmem:[#allocation3 + $0x260] sm:$0xff]  ;;  %v111_v51 = vld [vmem:[#allocation3 + $0x250] sm:$0xff]  ;;  %v729_v52 = vpack.c.bf16 %v116_v45, %v112_v44  ;;  %v118_v54 = vld [vmem:[#allocation3 + $0x288] sm:$0xff] }
  0x2e   :  { %718 = vmatprep.subr.bf16.mxu1 %v717_v16  ;;  %v115_v53 = vld [vmem:[#allocation3 + $0x270] sm:$0xff]  ;;  %v122_v55 = vld [vmem:[#allocation3 + $0x2a8] sm:$0xff]  ;;  %v120_v56 = vld [vmem:[#allocation3 + $0x298] sm:$0xff]  ;;  %v667_v58 = vpack.c.bf16 %v113_v50, %v109_v49 }
  0x2f   :  { %v124_v57 = vld [vmem:[#allocation3 + $0x2b8] sm:$0xff]  ;;  %v731_v59 = vpack.c.bf16 %v115_v53, %v111_v51  ;;  %v669_v60 = vpack.c.bf16 %v122_v55, %v118_v54  ;;  %v117_v61 = vld [vmem:[#allocation3 + $0x280] sm:$0xff]  ;;  %v119_v63 = vld [vmem:[#allocation3 + $0x290] sm:$0xff] }
  0x30   :  { %656 = vmatpush1.bf16.msra.mxu0 %v655_v22  ;;  %v121_v62 = vld [vmem:[#allocation3 + $0x2a0] sm:$0xff]  ;;  %v733_v0 = vpack.c.bf16 %v124_v57, %v120_v56  ;;  %v123_v1 = vld [vmem:[#allocation3 + $0x2b0] sm:$0xff]  ;;  %v126_v2 = vld [vmem:[#allocation3 + $0x2c8] sm:$0xff] }
  0x31   :  { %720 = vmatpush1.bf16.msra.mxu1 %v719_v23  ;;  %658 = vmatprep.subr.bf16.mxu0 %v657_v24  ;;  %v130_v3 = vld [vmem:[#allocation3 + $0x2e8] sm:$0xff]  ;;  %v128_v4 = vld [vmem:[#allocation3 + $0x2d8] sm:$0xff]  ;;  %v671_v6 = vpack.c.bf16 %v121_v62, %v117_v61  ;;  %v125_v7 = vld [vmem:[#allocation3 + $0x2c0] sm:$0xff]  ;;  %v735_v8 = vpack.c.bf16 %v123_v1, %v119_v63 }
  0x32   :  { %722 = vmatprep.subr.bf16.mxu1 %v721_v28  ;;  %v132_v5 = vld [vmem:[#allocation3 + $0x2f8] sm:$0xff]  ;;  %v673_v9 = vpack.c.bf16 %v130_v3, %v126_v2  ;;  %v129_v10 = vld [vmem:[#allocation3 + $0x2e0] sm:$0xff]  ;;  %v127_v11 = vld [vmem:[#allocation3 + $0x2d0] sm:$0xff] }
  0x33   :  { %v131_v12 = vld [vmem:[#allocation3 + $0x2f0] sm:$0xff]  ;;  %v737_v13 = vpack.c.bf16 %v132_v5, %v128_v4  ;;  %v134_v14 = vld [vmem:[#allocation3 + $0x308] sm:$0xff]  ;;  %v923_v16 = vld [vmem:[%s1139_s0] sm:$0xff]  ;;  %v675_v20 = vpack.c.bf16 %v129_v10, %v125_v7 }
  0x34   :  { %660 = vmatpush1.bf16.msra.mxu0 %v659_v34  ;;  %v138_v15 = vld [vmem:[#allocation3 + $0x328] sm:$0xff]  ;;  %v136_v17 = vld [vmem:[#allocation3 + $0x318] sm:$0xff]  ;;  %v188_v19 = vcombine.high %v923_v16, %v923_v16  ;;  %v739_v21 = vpack.c.bf16 %v131_v12, %v127_v11  ;;  %v133_v23 = vld [vmem:[#allocation3 + $0x300] sm:$0xff] }
  0x35   :  { %724 = vmatpush1.bf16.msra.mxu1 %v723_v35  ;;  %662 = vmatprep.subr.bf16.mxu0 %v661_v36  ;;  %v140_v18 = vld [vmem:[#allocation3 + $0x338] sm:$0xff]  ;;  %v677_v22 = vpack.c.bf16 %v138_v15, %v134_v14  ;;  %v137_v24 = vld [vmem:[#allocation3 + $0x320] sm:$0xff]  ;;  %v135_v25 = vld [vmem:[#allocation3 + $0x310] sm:$0xff] }
  0x36   :  { %726 = vmatprep.subr.bf16.mxu1 %v725_v40  ;;  %v741_v26 = vpack.c.bf16 %v140_v18, %v136_v17  ;;  %v139_v27 = vld [vmem:[#allocation3 + $0x330] sm:$0xff]  ;;  %v142_v28 = vld [vmem:[#allocation3 + $0x348] sm:$0xff]  ;;  %254 = vmatprep.mubr.f32.mxu0 %v188_v19  ;;  %v144_v30 = vld [vmem:[#allocation3 + $0x358] sm:$0xff]  ;;  %v679_v32 = vpack.c.bf16 %v137_v24, %v133_v23 }
  0x37   :  { %v146_v29 = vld [vmem:[#allocation3 + $0x368] sm:$0xff]  ;;  %v148_v31 = vld [vmem:[#allocation3 + $0x378] sm:$0xff]  ;;  %325 = vmatprep.mubr.f32.mxu1 %v188_v19  ;;  %v743_v33 = vpack.c.bf16 %v139_v27, %v135_v25  ;;  %v141_v35 = vld [vmem:[#allocation3 + $0x340] sm:$0xff] }
  0x38   :  { %664 = vmatpush1.bf16.msra.mxu0 %v663_v46  ;;  %v681_v34 = vpack.c.bf16 %v146_v29, %v142_v28  ;;  %v145_v36 = vld [vmem:[#allocation3 + $0x360] sm:$0xff]  ;;  %v143_v37 = vld [vmem:[#allocation3 + $0x350] sm:$0xff]  ;;  %v745_v38 = vpack.c.bf16 %v148_v31, %v144_v30  ;;  %v150_v40 = vld [vmem:[#allocation3 + $0x388] sm:$0xff] }
  0x39   :  { %728 = vmatpush1.bf16.msra.mxu1 %v727_v47  ;;  %666 = vmatprep.subr.bf16.mxu0 %v665_v48  ;;  %v147_v39 = vld [vmem:[#allocation3 + $0x370] sm:$0xff]  ;;  %v154_v41 = vld [vmem:[#allocation3 + $0x3a8] sm:$0xff]  ;;  %v152_v42 = vld [vmem:[#allocation3 + $0x398] sm:$0xff]  ;;  %v683_v44 = vpack.c.bf16 %v145_v36, %v141_v35 }
  0x3a   :  { %730 = vmatprep.subr.bf16.mxu1 %v729_v52  ;;  %v156_v43 = vld [vmem:[#allocation3 + $0x3b8] sm:$0xff]  ;;  %v747_v45 = vpack.c.bf16 %v147_v39, %v143_v37  ;;  %v685_v46 = vpack.c.bf16 %v154_v41, %v150_v40  ;;  %v149_v47 = vld [vmem:[#allocation3 + $0x380] sm:$0xff]  ;;  %v151_v49 = vld [vmem:[#allocation3 + $0x390] sm:$0xff] }
  0x3b   :  { %v153_v48 = vld [vmem:[#allocation3 + $0x3a0] sm:$0xff]  ;;  %v749_v50 = vpack.c.bf16 %v156_v43, %v152_v42  ;;  %v155_v51 = vld [vmem:[#allocation3 + $0x3b0] sm:$0xff]  ;;  %v158_v52 = vld [vmem:[#allocation3 + $0x3c8] sm:$0xff] }
  0x3c   :  { %668 = vmatpush1.bf16.msra.mxu0 %v667_v58  ;;  %v162_v53 = vld [vmem:[#allocation3 + $0x3e8] sm:$0xff]  ;;  %v160_v54 = vld [vmem:[#allocation3 + $0x3d8] sm:$0xff]  ;;  %v687_v56 = vpack.c.bf16 %v153_v48, %v149_v47  ;;  %v751_v57 = vpack.c.bf16 %v155_v51, %v151_v49  ;;  %v159_v61 = vld [vmem:[#allocation3 + $0x3d0] sm:$0xff] }
  0x3d   :  { %732 = vmatpush1.bf16.msra.mxu1 %v731_v59  ;;  %670 = vmatprep.subr.bf16.mxu0 %v669_v60  ;;  %v164_v55 = vld [vmem:[#allocation3 + $0x3f8] sm:$0xff]  ;;  %v689_v58 = vpack.c.bf16 %v162_v53, %v158_v52  ;;  %v157_v59 = vld [vmem:[#allocation3 + $0x3c0] sm:$0xff]  ;;  %v163_v63 = vld [vmem:[#allocation3 + $0x3f0] sm:$0xff] }
  0x3e   :  { %734 = vmatprep.subr.bf16.mxu1 %v733_v0  ;;  %v161_v60 = vld [vmem:[#allocation3 + $0x3e0] sm:$0xff]  ;;  %v753_v62 = vpack.c.bf16 %v164_v55, %v160_v54  ;;  %v353_v1 = vld [vmem:[%s1142_s3 + $0x88] sm:$0xff]  ;;  %v755_v5 = vpack.c.bf16 %v163_v63, %v159_v61  ;;  %v354_v12 = vld [vmem:[%s1142_s3 + $0x90] sm:$0xff] }
  0x3f   :  { %v352_v0 = vld [vmem:[%s1142_s3 + $0x80] sm:$0xff]  ;;  %v385_v3 = vld [vmem:[%s1142_s3 + $0x188] sm:$0xff]  ;;  %v691_v4 = vpack.c.bf16 %v161_v60, %v157_v59  ;;  %v386_v14 = vld [vmem:[%s1142_s3 + $0x190] sm:$0xff] }
  0x40   :  { %672 = vmatpush1.bf16.msra.mxu0 %v671_v6  ;;  %v384_v2 = vld [vmem:[%s1142_s3 + $0x180] sm:$0xff]  ;;  %v757_v6 = vpack.c.bf16 %v353_v1, %v352_v0  ;;  %v369_v11 = vld [vmem:[%s1142_s3 + $0x108] sm:$0xff]  ;;  %v387_v15 = vld [vmem:[%s1142_s3 + $0x198] sm:$0xff] }
  0x41   :  { %736 = vmatpush1.bf16.msra.mxu1 %v735_v8  ;;  %674 = vmatprep.subr.bf16.mxu0 %v673_v9  ;;  %v336_v7 = vld [vmem:[%s1142_s3] sm:$0xff]  ;;  %v337_v8 = vld [vmem:[%s1142_s3 + $0x8] sm:$0xff]  ;;  %v789_v10 = vpack.c.bf16 %v385_v3, %v384_v2  ;;  %v793_v23 = vpack.c.bf16 %v387_v15, %v386_v14  ;;  %v371_v24 = vld [vmem:[%s1142_s3 + $0x118] sm:$0xff] }
  0x42   :  { %738 = vmatprep.subr.bf16.mxu1 %v737_v13  ;;  %v368_v9 = vld [vmem:[%s1142_s3 + $0x100] sm:$0xff]  ;;  %v355_v13 = vld [vmem:[%s1142_s3 + $0x98] sm:$0xff]  ;;  %v759_v17 = vpack.c.bf16 %v337_v8, %v336_v7  ;;  %v389_v28 = vld [vmem:[%s1142_s3 + $0x1a8] sm:$0xff] }
  0x43   :  { %v791_v18 = vpack.c.bf16 %v369_v11, %v368_v9  ;;  %v761_v19 = vpack.c.bf16 %v355_v13, %v354_v12  ;;  %v356_v25 = vld [vmem:[%s1142_s3 + $0xa0] sm:$0xff]  ;;  %v373_v35 = vld [vmem:[%s1142_s3 + $0x128] sm:$0xff]  ;;  %v358_v36 = vld [vmem:[%s1142_s3 + $0xb0] sm:$0xff] }
  0x44   :  { %676 = vmatpush1.bf16.msra.mxu0 %v675_v20  ;;  %v338_v20 = vld [vmem:[%s1142_s3 + $0x10] sm:$0xff]  ;;  %v388_v27 = vld [vmem:[%s1142_s3 + $0x1a0] sm:$0xff]  ;;  %v359_v37 = vld [vmem:[%s1142_s3 + $0xb8] sm:$0xff] }
  0x45   :  { %740 = vmatpush1.bf16.msra.mxu1 %v739_v21  ;;  %678 = vmatprep.subr.bf16.mxu0 %v677_v22  ;;  %v339_v21 = vld [vmem:[%s1142_s3 + $0x18] sm:$0xff]  ;;  %v370_v22 = vld [vmem:[%s1142_s3 + $0x110] sm:$0xff]  ;;  %v769_v42 = vpack.c.bf16 %v359_v37, %v358_v36  ;;  %v360_v48 = vld [vmem:[%s1142_s3 + $0xc0] sm:$0xff] }
  0x46   :  { %742 = vmatprep.subr.bf16.mxu1 %v741_v26  ;;  %v357_v26 = vld [vmem:[%s1142_s3 + $0xa8] sm:$0xff]  ;;  %v763_v29 = vpack.c.bf16 %v339_v21, %v338_v20  ;;  %v795_v30 = vpack.c.bf16 %v371_v24, %v370_v22  ;;  %v391_v39 = vld [vmem:[%s1142_s3 + $0x1b8] sm:$0xff]  ;;  %v342_v43 = vld [vmem:[%s1142_s3 + $0x30] sm:$0xff] }
  0x47   :  { %v765_v31 = vpack.c.bf16 %v357_v26, %v356_v25  ;;  %v375_v47 = vld [vmem:[%s1142_s3 + $0x138] sm:$0xff]  ;;  %v361_v49 = vld [vmem:[%s1142_s3 + $0xc8] sm:$0xff]  ;;  %v344_v55 = vld [vmem:[%s1142_s3 + $0x40] sm:$0xff] }
  0x48   :  { %680 = vmatpush1.bf16.msra.mxu0 %v679_v32  ;;  %v340_v32 = vld [vmem:[%s1142_s3 + $0x20] sm:$0xff]  ;;  %v393_v51 = vld [vmem:[%s1142_s3 + $0x1c8] sm:$0xff]  ;;  %v773_v54 = vpack.c.bf16 %v361_v49, %v360_v48  ;;  %v362_v60 = vld [vmem:[%s1142_s3 + $0xd0] sm:$0xff] }
  0x49   :  { %744 = vmatpush1.bf16.msra.mxu1 %v743_v33  ;;  %682 = vmatprep.subr.bf16.mxu0 %v681_v34  ;;  %v341_v33 = vld [vmem:[%s1142_s3 + $0x28] sm:$0xff]  ;;  %v372_v34 = vld [vmem:[%s1142_s3 + $0x120] sm:$0xff]  ;;  %v363_v61 = vld [vmem:[%s1142_s3 + $0xd8] sm:$0xff] }
  0x4a   :  { %746 = vmatprep.subr.bf16.mxu1 %v745_v38  ;;  %v390_v38 = vld [vmem:[%s1142_s3 + $0x1b0] sm:$0xff]  ;;  %v767_v40 = vpack.c.bf16 %v341_v33, %v340_v32  ;;  %v799_v41 = vpack.c.bf16 %v373_v35, %v372_v34  ;;  %v377_v59 = vld [vmem:[%s1142_s3 + $0x148] sm:$0xff]  ;;  %v395_v63 = vld [vmem:[%s1142_s3 + $0x1d8] sm:$0xff]  ;;  %v777_v2 = vpack.c.bf16 %v363_v61, %v362_v60 }
  0x4b   :  { %v346_v3 = vld [vmem:[%s1142_s3 + $0x50] sm:$0xff]  ;;  %v379_v7 = vld [vmem:[%s1142_s3 + $0x158] sm:$0xff]  ;;  %v364_v8 = vld [vmem:[%s1142_s3 + $0xe0] sm:$0xff] }
  0x4c   :  { %684 = vmatpush1.bf16.msra.mxu0 %v683_v44  ;;  %v343_v44 = vld [vmem:[%s1142_s3 + $0x38] sm:$0xff]  ;;  %v365_v9 = vld [vmem:[%s1142_s3 + $0xe8] sm:$0xff]  ;;  %v398_v25 = vld [vmem:[%s1142_s3 + $0x1f0] sm:$0xff] }
  0x4d   :  { %748 = vmatpush1.bf16.msra.mxu1 %v747_v45  ;;  %686 = vmatprep.subr.bf16.mxu0 %v685_v46  ;;  %v374_v45 = vld [vmem:[%s1142_s3 + $0x130] sm:$0xff]  ;;  %v801_v46 = vpack.c.bf16 %v391_v39, %v390_v38  ;;  %v771_v52 = vpack.c.bf16 %v343_v44, %v342_v43  ;;  %v397_v11 = vld [vmem:[%s1142_s3 + $0x1e8] sm:$0xff]  ;;  %v781_v14 = vpack.c.bf16 %v365_v9, %v364_v8  ;;  %v367_v24 = vld [vmem:[%s1142_s3 + $0xf8] sm:$0xff] }
  0x4e   :  { %750 = vmatprep.subr.bf16.mxu1 %v749_v50  ;;  %v392_v50 = vld [vmem:[%s1142_s3 + $0x1c0] sm:$0xff]  ;;  %v803_v53 = vpack.c.bf16 %v375_v47, %v374_v45  ;;  %v381_v21 = vld [vmem:[%s1142_s3 + $0x168] sm:$0xff]  ;;  %v382_v32 = vld [vmem:[%s1142_s3 + $0x170] sm:$0xff] }
  0x4f   :  { %v383_v33 = vld [vmem:[%s1142_s3 + $0x178] sm:$0xff]  ;;  %v165_v37 = vld [vmem:[%s1141_s2] sm:$0xf] }
  0x50   :  { %688 = vmatpush1.bf16.msra.mxu0 %v687_v56  ;;  %v345_v56 = vld [vmem:[%s1142_s3 + $0x48] sm:$0xff]  ;;  %v819_v34 = vpack.c.bf16 %v383_v33, %v382_v32 }
  0x51   :  { %752 = vmatpush1.bf16.msra.mxu1 %v751_v57  ;;  %690 = vmatprep.subr.bf16.mxu0 %v689_v58  ;;  %v376_v57 = vld [vmem:[%s1142_s3 + $0x140] sm:$0xff]  ;;  %v805_v58 = vpack.c.bf16 %v393_v51, %v392_v50  ;;  %v775_v0 = vpack.c.bf16 %v345_v56, %v344_v55 }
  0x52   :  { %754 = vmatprep.subr.bf16.mxu1 %v753_v62  ;;  %v394_v62 = vld [vmem:[%s1142_s3 + $0x1d0] sm:$0xff]  ;;  %v807_v1 = vpack.c.bf16 %v377_v59, %v376_v57  ;;  %v401_v59 = vstv %s1143_s4 }
  0x54   :  { %692 = vmatpush1.bf16.msra.mxu0 %v691_v4  ;;  %v347_v4 = vld [vmem:[%s1142_s3 + $0x58] sm:$0xff] }
  0x55   :  { %756 = vmatpush1.bf16.msra.mxu1 %v755_v5  ;;  %758 = vmatprep.subr.bf16.mxu0 %v757_v6  ;;  %v378_v5 = vld [vmem:[%s1142_s3 + $0x150] sm:$0xff]  ;;  %v809_v6 = vpack.c.bf16 %v395_v63, %v394_v62  ;;  %v779_v12 = vpack.c.bf16 %v347_v4, %v346_v3 }
  0x56   :  { %790 = vmatprep.subr.bf16.mxu1 %v789_v10  ;;  %v396_v10 = vld [vmem:[%s1142_s3 + $0x1e0] sm:$0xff]  ;;  %v811_v13 = vpack.c.bf16 %v379_v7, %v378_v5 }
  0x57   :  { %255 = vmatmul.mubr.f32.vlgmr.msra.gmra.mrb[0].mxu0 %v923_v16  ;;  %v813_v15 = vpack.c.bf16 %v397_v11, %v396_v10 }
  0x58   :  { %326 = vmatmul.mubr.f32.vlgmr.msra.gmra.mrb[0].mxu1 %v923_v16  ;;  %760 = vmatpush3.bf16.msra.mxu0 %v759_v17  ;;  %v797_v16 = vpack.c.bf16 %v389_v28, %v388_v27  ;;  %v348_v17 = vld [vmem:[%s1142_s3 + $0x60] sm:$0xff]  ;;  %v399_v27 = vld [vmem:[%s1142_s3 + $0x1f8] sm:$0xff]  ;;  %v350_v28 = vld [vmem:[%s1142_s3 + $0x70] sm:$0xff] }
  0x59   :  { %792 = vmatpush3.bf16.msra.mxu1 %v791_v18  ;;  %762 = vmatprep.subr.bf16.mxu0 %v761_v19  ;;  %v349_v18 = vld [vmem:[%s1142_s3 + $0x68] sm:$0xff]  ;;  %v380_v19 = vld [vmem:[%s1142_s3 + $0x160] sm:$0xff] }
  0x5a   :  { %794 = vmatprep.subr.bf16.mxu1 %v793_v23  ;;  %v783_v20 = vpack.c.bf16 %v349_v18, %v348_v17  ;;  %v815_v22 = vpack.c.bf16 %v381_v21, %v380_v19  ;;  %v366_v23 = vld [vmem:[%s1142_s3 + $0xf0] sm:$0xff] }
  0x5b   :  { %v785_v26 = vpack.c.bf16 %v367_v24, %v366_v23 }
  0x5c   :  { %764 = vmatpush3.bf16.msra.mxu0 %v763_v29  ;;  %v351_v29 = vld [vmem:[%s1142_s3 + $0x78] sm:$0xff] }
  0x5d   :  { %796 = vmatpush3.bf16.msra.mxu1 %v795_v30  ;;  %766 = vmatprep.subr.bf16.mxu0 %v765_v31  ;;  %v817_v30 = vpack.c.bf16 %v399_v27, %v398_v25  ;;  %v787_v31 = vpack.c.bf16 %v351_v29, %v350_v28 }
  0x5e   :  { %798 = vmatprep.subr.bf16.mxu1 %v797_v16  ;;  %v167_v16 = vlaneseq }
  0x60   :  { %768 = vmatpush3.bf16.msra.mxu0 %v767_v40  ;;  %v168_v35 = vshrl.u32 %v167_v16, 7 }
  0x61   :  { %800 = vmatpush3.bf16.msra.mxu1 %v799_v41  ;;  %770 = vmatprep.subr.bf16.mxu0 %v769_v42 }
  0x62   :  { %802 = vmatprep.subr.bf16.mxu1 %v801_v46  ;;  %v169_v36 = vsub.s32 0, %v168_v35  ;;  %v177_v38 = vsub.s32 2, %v168_v35  ;;  %v173_v39 = vsub.s32 1, %v168_v35  ;;  %v181_v40 = vsub.s32 3, %v168_v35 }
  0x64   :  { %772 = vmatpush3.bf16.msra.mxu0 %v771_v52  ;;  %v170_v41 = vrot.slane %v165_v37, %v169_v36  ;;  %v178_v42 = vrot.slane %v165_v37, %v177_v38  ;;  %v174_v43 = vrot.slane %v165_v37, %v173_v39  ;;  %v182_v44 = vrot.slane %v165_v37, %v181_v40 }
  0x65   :  { %804 = vmatpush3.bf16.msra.mxu1 %v803_v53  ;;  %774 = vmatprep.subr.bf16.mxu0 %v773_v54 }
  0x66   :  { %806 = vmatprep.subr.bf16.mxu1 %v805_v58 }
  0x68   :  { %776 = vmatpush3.bf16.msra.mxu0 %v775_v0 }
  0x69   :  { %808 = vmatpush3.bf16.msra.mxu1 %v807_v1  ;;  %778 = vmatprep.subr.bf16.mxu0 %v777_v2 }
  0x6a   :  { %810 = vmatprep.subr.bf16.mxu1 %v809_v6 }
  0x6c   :  { %780 = vmatpush3.bf16.msra.mxu0 %v779_v12 }
  0x6d   :  { %812 = vmatpush3.bf16.msra.mxu1 %v811_v13  ;;  %782 = vmatprep.subr.bf16.mxu0 %v781_v14 }
  0x6e   :  { %814 = vmatprep.subr.bf16.mxu1 %v813_v15 }
  0x70   :  { %784 = vmatpush3.bf16.msra.mxu0 %v783_v20 }
  0x71   :  { %816 = vmatpush3.bf16.msra.mxu1 %v815_v22  ;;  %786 = vmatprep.subr.bf16.mxu0 %v785_v26 }
  0x72   :  { %818 = vmatprep.subr.bf16.mxu1 %v817_v30 }
  0x74   :  { %788 = vmatpush3.bf16.msra.mxu0 %v787_v31 }
  0x75   :  { %820 = vmatpush3.bf16.msra.mxu1 %v819_v34 }
 0x12a   :  { %v256_v45 = vpop.f32.mrb[0].mxu0 }
 0x12b   :  { %v257_v46 = vadd.f32 %v256_v45, %v170_v41  ;;  %v327_v47 = vpop.f32.mrb[0].mxu1  ;;  %v258_v48 = vpop.f32.mrb[1].mxu0 }
 0x12c   :  { %v328_v49 = vadd.f32 %v327_v47, %v178_v42  ;;  %v259_v50 = vadd.f32 %v258_v48, %v174_v43  ;;  %v329_v51 = vpop.f32.mrb[1].mxu1 }
 0x12d   :  { %v330_v52 = vadd.f32 %v329_v51, %v182_v44  ;;  %v332_v55 = vmax.f32 %v257_v46, 0.0 }
 0x12e   :  { %v334_v53 = vmax.f32 %v328_v49, 0.0  ;;  %v333_v54 = vmax.f32 %v259_v50, 0.0 }
 0x12f   :  { %v335_v56 = vmax.f32 %v330_v52, 0.0 }
 0x130   :  { %466 = vmatprep.mubr.f32.mxu0 %v333_v54 }
 0x131   :  { %536 = vmatprep.mubr.f32.mxu1 %v335_v56  ;;  %467 = vmatmul.mubr.f32.vlgmr.msra.gmra.mrb[2].mxu0 %v332_v55 }
 0x132   :  { %537 = vmatmul.mubr.f32.vlgmr.msra.gmra.mrb[2].mxu1 %v334_v53 }
 0x204   :  { %v591_v57 = vpop.f32.mrb[2].mxu0 }
 0x205   :  { %v626_v58 = vpop.f32.mrb[2].mxu1  ;;  %v592_v60 = vpop.f32.mrb[3].mxu0 }
 0x206   :  { %v593_v61 = vadd.f32 %v592_v60, %v591_v57  ;;  %v627_v62 = vpop.f32.mrb[3].mxu1 }
 0x207   :  { %v628_v63 = vadd.f32 %v627_v62, %v626_v58 }
 0x208   :  { %v469_v0 = vadd.f32 %v593_v61, %v401_v59 }
 0x20a   :  { %v539_v1 = vadd.f32 %v628_v63, %v469_v0 }
 0x20c   :  { %543 = vst.msk [vmem:[#allocation6] sm:$0xf] %vm542_vm0, %v539_v1 }
 0x20d   :  { %859 = shalt.err (!%p856_p12)
}
 0x20e   :  { %s860_s7 = scalar_lea.hbm %s1144_s5, 64 }
 0x20f   :  { %p861_p13 = scmp.ne.s32.totalorder %s1144_s5, %s860_s7  ;;  %p864_p0 = scmp.lt.u32.totalorder %s860_s7, %s1144_s5 }
 0x211   :  { %p866_p1 = pnand %p864_p0, %p861_p13 }
 0x213   :  { %869 = shalt.err (!%p866_p1)
}
 0x214   :  { %553 = dma.vmem_to_hbm [thread:$0]  %s551_s30, 64, %s1144_s5, [#allocation5]  }
 0x215   :  { %872 = dma.done.wait [#allocation5], 64  }
 0x216   :  { %873 = vsyncadd [#allocation5], 4294967232 }
 0x217   :  { %557 = vsyncpa [#allocation4], 1 }
 0x218   :  { %558 = vsyncpa [#allocation5], 1 }

</bundles_post_ra>
